<compile_context>
chip_gen: v6e
topology: v6e:2x2x1
jax: 0.10.0
libtpu: 0.0.40
codegen_flags: <defaults>
</compile_context>

<pallas_src>
import functools

import jax
import jax.numpy as jnp
import numpy as np
from jax.experimental import pallas as pl
from jax.experimental.pallas import tpu as pltpu

OUT_PAD = 128  # lane-pad W2/b2 so the second matmul keeps MXU-friendly shapes


def _round_up(n: int, m: int) -> int:
    return ((n + m - 1) // m) * m


def _ffn_kernel(x_ref, w1_ref, b1_ref, w2_ref, b2_ref, ot_ref):
    # Cast the activation tile to the MXU compute dtype in-kernel: avoids a
    # separate un-fused XLA pass over x when callers hold f32 activations.
    x = x_ref[...].astype(w1_ref.dtype)
    # Hidden layer: [tm, D] @ [D, D] -> f32 accumulation on the MXU.
    h = jnp.dot(x, w1_ref[...], preferred_element_type=jnp.float32)
    h = jnp.maximum(h + b1_ref[...], 0.0)
    # TODO(synk): Dropout is identity in eval mode; not applied here.
    # Output layer: [tm, D] @ [D, OUT_PAD] -> f32 accumulation.
    out = jnp.dot(h.astype(w2_ref.dtype), w2_ref[...],
                  preferred_element_type=jnp.float32)
    out = out + b2_ref[...]
    # Lane-dense store: transpose [tm, OUT_PAD] -> [OUT_PAD, tm] on the XLU
    # (both dims (8,128)-tile aligned), then store only the real logit rows.
    # The HBM writeback is then 2 contiguous rows of tm*4 bytes per step
    # instead of tm strided 8-byte chunks behind masked partial stores.
    out_t = jnp.transpose(out)                       # [OUT_PAD, tm]
    ot_ref[...] = out_t[: ot_ref.shape[0], :].astype(ot_ref.dtype)


def prepare_params(w1, b1, w2, b2, compute_dtype=jnp.bfloat16):
    """One-time weight prep (probe init, outside the per-call hot path)."""
    D, out_dim = w2.shape
    assert out_dim <= OUT_PAD, (
        f"out_dim={out_dim} exceeds OUT_PAD={OUT_PAD}; raise OUT_PAD.")
    w1c = w1.astype(compute_dtype)                               # [D, D] bf16
    w2p = jnp.zeros((D, OUT_PAD), dtype=compute_dtype)
    w2p = w2p.at[:, :out_dim].set(w2.astype(compute_dtype))      # [D, 128] bf16
    b1r = b1.reshape(1, D).astype(jnp.float32)                   # [1, D] f32
    b2p = jnp.zeros((1, OUT_PAD), dtype=jnp.float32)
    b2p = b2p.at[0, :out_dim].set(b2.astype(jnp.float32))        # [1, 128] f32
    return w1c, b1r, w2p, b2p


@functools.partial(jax.jit, static_argnames=("out_dim", "tm"))
def feedforward_probe_forward(x, w1c, b1r, w2p, b2p, *, out_dim=2, tm=512):
    """x: [N, D] (f32 or bf16). w1c: [D, D], b1r: [1, D], w2p: [D, 128], b2p: [1, 128]."""
    N, D = x.shape
    assert tm % 128 == 0, "tm must be a multiple of 128 lanes"

    # Effective row tile: as large as tm, but (a) no larger than needed and
    # (b) small enough that there are >= 2 grid steps when possible so both
    # v7x TensorCores get work ('parallel' axis sharding).
    half_cap = max(128, _round_up(-(-N // 2), 128))
    tm_eff = min(tm, _round_up(N, 128), half_cap)
    n_blocks = pl.cdiv(N, tm_eff)   # last block may be partial: no jnp.pad(x)

    # Explicit scoped-VMEM budget: 2x x tile (double-buffered) + single-
    # buffered resident weights/biases + 2x out tile + f32 intermediates,
    # with 2x headroom (floor at the 16 MiB default, cap at v7x-safe 64 MiB).
    x_itemsize = jnp.dtype(x.dtype).itemsize
    w_itemsize = jnp.dtype(w1c.dtype).itemsize
    needed = (
        2 * tm_eff * D * x_itemsize                 # x tiles (double-buffered)
        + (D * D + D * OUT_PAD) * w_itemsize        # W1, W2 (single-buffered)
        + (8 * D + 8 * OUT_PAD) * 4                 # b1, b2 (sublane-padded)
        + 2 * 8 * tm_eff * 4                        # out tiles (double-buffered)
        + tm_eff * D * 4                            # h intermediate (f32)
        + 2 * tm_eff * OUT_PAD * 4                  # out / out_t intermediates
    )
    vmem_limit = int(max(16 * 1024 * 1024,
                         min(2 * needed + (4 << 20), 64 * 1024 * 1024)))

    logits_t = pl.pallas_call(
        _ffn_kernel,
        out_shape=jax.ShapeDtypeStruct((out_dim, N), jnp.float32),
        grid_spec=pltpu.PrefetchScalarGridSpec(
            num_scalar_prefetch=0,
            grid=(n_blocks,),
            in_specs=[
                pl.BlockSpec((tm_eff, D), lambda i: (i, 0)),      # x tile
                # Resident operands: constant index_map -> fetched once;
                # single-buffered to halve their VMEM footprint.
                # TODO(synk): for D >= ~2048 on v7x (64 MiB VMEM), K-tile W1
                # with an 'arbitrary' reduction axis + f32 accumulator
                # instead of keeping the full [D, D] block resident.
                pl.BlockSpec((D, D), lambda i: (0, 0),
                             pipeline_mode=pl.Buffered(1)),        # W1
                pl.BlockSpec((1, D), lambda i: (0, 0),
                             pipeline_mode=pl.Buffered(1)),        # b1
                pl.BlockSpec((D, OUT_PAD), lambda i: (0, 0),
                             pipeline_mode=pl.Buffered(1)),        # W2 (padded)
                pl.BlockSpec((1, OUT_PAD), lambda i: (0, 0),
                             pipeline_mode=pl.Buffered(1)),        # b2 (padded)
            ],
            # Transposed, lane-dense output: [out_dim, N] with tm_eff lanes.
            out_specs=pl.BlockSpec((out_dim, tm_eff), lambda i: (0, i)),
        ),
        compiler_params=pltpu.CompilerParams(
            dimension_semantics=("parallel",),
            vmem_limit_bytes=vmem_limit,
        ),
    )(x, w1c, b1r, w2p, b2p)

    # Un-transpose in the wrapper (tiny: 8*N bytes vs the kernel's 2*D*N read).
    return logits_t.T


def _xavier_uniform(key, fan_in, fan_out, dtype=jnp.float32):
    # Matches torch.nn.init.xavier_uniform_ for a (fan_out, fan_in) weight,
    # sampled directly in the transposed (fan_in, fan_out) kernel layout.
    limit = np.sqrt(6.0 / (fan_in + fan_out))
    return jax.random.uniform(key, (fan_in, fan_out), dtype=dtype,
                              minval=-limit, maxval=limit)


if __name__ == "__main__":
    # Small, kernel-friendly shapes (embedding_dim=256, num_layers=2, 2 classes).
    # N is deliberately NOT a multiple of tm_eff so the partial-last-block
    # path (no wrapper-side padding) and the >=2-grid-step path are exercised.
    N, D, OUT, TM = 384, 256, 2, 512

    key = jax.random.PRNGKey(0)
    kx, kw1, kw2 = jax.random.split(key, 3)

    x = jax.random.normal(kx, (N, D), dtype=jnp.float32)   # f32: cast happens in-kernel
    w1 = _xavier_uniform(kw1, D, D)          # [D, D]  (transposed Linear weight)
    b1 = jnp.zeros((D,), dtype=jnp.float32)  # zeros, as in _initialize_weights
    w2 = _xavier_uniform(kw2, D, OUT)        # [D, 2]
    b2 = jnp.zeros((OUT,), dtype=jnp.float32)

    # One-time prep (probe init).
    w1c, b1r, w2p, b2p = prepare_params(w1, b1, w2, b2)

    logits = feedforward_probe_forward(x, w1c, b1r, w2p, b2p, out_dim=OUT, tm=TM)
    logits = jax.block_until_ready(logits)
    assert logits.shape == (N, OUT)

    # Reference: f32 math over the same bf16-quantized operands (the kernel
    # casts x and h to bf16 for the MXU and accumulates in f32).
    xq = x.astype(jnp.bfloat16).astype(jnp.float32)
    w1f = w1c.astype(jnp.float32)
    w2f = w2p[:, :OUT].astype(jnp.float32)
    h = jnp.maximum(xq @ w1f + b1, 0.0)
    h = h.astype(jnp.bfloat16).astype(jnp.float32)   # kernel re-quantizes h too
    ref = h @ w2f + b2
    np.testing.assert_allclose(np.asarray(logits), np.asarray(ref),
                               rtol=1e-2, atol=1e-2)

    print("KERNEL_OK")
</pallas_src>

<mosaic_0001>
module attributes {stable_mosaic.version = 11 : i64} {
  func.func @_ffn_kernel(%arg0: i32, %arg1: memref<256x256xf32, #tpu.memory_space<vmem>>, %arg2: memref<256x256xbf16, #tpu.memory_space<vmem>>, %arg3: memref<1x256xf32, #tpu.memory_space<vmem>>, %arg4: memref<256x128xbf16, #tpu.memory_space<vmem>>, %arg5: memref<1x128xf32, #tpu.memory_space<vmem>>, %arg6: memref<2x256xf32, #tpu.memory_space<vmem>>) attributes {dimension_semantics = [#tpu.dimension_semantics<parallel>], iteration_bounds = array<i64: 2>, scalar_prefetch = 0 : i64, scratch_operands = 0 : i64, tpu.core_type = #tpu.core_type<tc>, window_params = [{transform_indices = @transform_0, window_bounds = array<i64: 256, 256>}, {pipeline_mode = #tpu.pipeline_mode<synchronous>, transform_indices = @transform_1, window_bounds = array<i64: 256, 256>}, {pipeline_mode = #tpu.pipeline_mode<synchronous>, transform_indices = @transform_2, window_bounds = array<i64: 1, 256>}, {pipeline_mode = #tpu.pipeline_mode<synchronous>, transform_indices = @transform_3, window_bounds = array<i64: 256, 128>}, {pipeline_mode = #tpu.pipeline_mode<synchronous>, transform_indices = @transform_4, window_bounds = array<i64: 1, 128>}, {transform_indices = @transform_5, window_bounds = array<i64: 2, 256>}]} {
    %c0 = arith.constant 0 : index
    %c0_0 = arith.constant 0 : index
    %0 = vector.load %arg1[%c0, %c0_0] : memref<256x256xf32, #tpu.memory_space<vmem>>, vector<256x256xf32>
    %1 = arith.truncf %0 : vector<256x256xf32> to vector<256x256xbf16>
    %c0_1 = arith.constant 0 : index
    %c0_2 = arith.constant 0 : index
    %2 = vector.load %arg2[%c0_1, %c0_2] : memref<256x256xbf16, #tpu.memory_space<vmem>>, vector<256x256xbf16>
    %cst = arith.constant dense<0.000000e+00> : vector<256x256xf32>
    %3 = tpu.matmul %1, %2, %cst {dimension_numbers = #tpu.dot_dimension_numbers<[1], [0], [0], [1], [0, 0, 1, 1], [], []>} : vector<256x256xbf16>, vector<256x256xbf16>, vector<256x256xf32> -> vector<256x256xf32>
    %c0_3 = arith.constant 0 : index
    %c0_4 = arith.constant 0 : index
    %4 = vector.load %arg3[%c0_3, %c0_4] : memref<1x256xf32, #tpu.memory_space<vmem>>, vector<1x256xf32>
    %5 = vector.broadcast %4 : vector<1x256xf32> to vector<256x256xf32>
    %6 = arith.addf %3, %5 : vector<256x256xf32>
    %cst_5 = arith.constant 0.000000e+00 : f32
    %7 = vector.broadcast %cst_5 : f32 to vector<256x256xf32>
    %8 = arith.maximumf %6, %7 : vector<256x256xf32>
    %9 = arith.truncf %8 : vector<256x256xf32> to vector<256x256xbf16>
    %c0_6 = arith.constant 0 : index
    %c0_7 = arith.constant 0 : index
    %10 = vector.load %arg4[%c0_6, %c0_7] : memref<256x128xbf16, #tpu.memory_space<vmem>>, vector<256x128xbf16>
    %cst_8 = arith.constant dense<0.000000e+00> : vector<256x128xf32>
    %11 = tpu.matmul %9, %10, %cst_8 {dimension_numbers = #tpu.dot_dimension_numbers<[1], [0], [0], [1], [0, 0, 1, 1], [], []>} : vector<256x256xbf16>, vector<256x128xbf16>, vector<256x128xf32> -> vector<256x128xf32>
    %c0_9 = arith.constant 0 : index
    %c0_10 = arith.constant 0 : index
    %12 = vector.load %arg5[%c0_9, %c0_10] : memref<1x128xf32, #tpu.memory_space<vmem>>, vector<1x128xf32>
    %13 = vector.broadcast %12 : vector<1x128xf32> to vector<256x128xf32>
    %14 = arith.addf %11, %13 : vector<256x128xf32>
    %15 = tpu.transpose %14, [1, 0] : vector<256x128xf32> -> vector<128x256xf32>
    %16 = vector.extract_strided_slice %15 {offsets = [0, 0], sizes = [2, 256], strides = [1, 1]} : vector<128x256xf32> to vector<2x256xf32>
    %c0_11 = arith.constant 0 : index
    %c0_12 = arith.constant 0 : index
    %17 = vector.load %arg6[%c0_11, %c0_12] : memref<2x256xf32, #tpu.memory_space<vmem>>, vector<2x256xf32>
    tpu.vector_store %arg6[%c0_11, %c0_12], %16 {strides = array<i32>} : memref<2x256xf32, #tpu.memory_space<vmem>>, vector<2x256xf32>,
    return
  }
  func.func @transform_0(%arg0: i32) -> (i32, i32) {
    %c0_i32 = arith.constant 0 : i32
    %c0_i32_0 = arith.constant 0 : i32
    return %arg0, %c0_i32 : i32, i32
  }
  func.func @transform_1(%arg0: i32) -> (i32, i32) {
    %c0_i32 = arith.constant 0 : i32
    %c0_i32_0 = arith.constant 0 : i32
    %c0_i32_1 = arith.constant 0 : i32
    return %c0_i32, %c0_i32_0 : i32, i32
  }
  func.func @transform_2(%arg0: i32) -> (i32, i32) {
    %c0_i32 = arith.constant 0 : i32
    %c0_i32_0 = arith.constant 0 : i32
    %c0_i32_1 = arith.constant 0 : i32
    return %c0_i32, %c0_i32_0 : i32, i32
  }
  func.func @transform_3(%arg0: i32) -> (i32, i32) {
    %c0_i32 = arith.constant 0 : i32
    %c0_i32_0 = arith.constant 0 : i32
    %c0_i32_1 = arith.constant 0 : i32
    return %c0_i32, %c0_i32_0 : i32, i32
  }
  func.func @transform_4(%arg0: i32) -> (i32, i32) {
    %c0_i32 = arith.constant 0 : i32
    %c0_i32_0 = arith.constant 0 : i32
    %c0_i32_1 = arith.constant 0 : i32
    return %c0_i32, %c0_i32_0 : i32, i32
  }
  func.func @transform_5(%arg0: i32) -> (i32, i32) {
    %c0_i32 = arith.constant 0 : i32
    %c0_i32_0 = arith.constant 0 : i32
    return %c0_i32, %arg0 : i32, i32
  }
}

</mosaic_0001>

<bundles_post_ra>
// kernel: feedforward_probe_forward.1
= control target key start
LH: loop header
LB: loop body
LE: loop exit
PB: predicated region body
PF: predicated region fallthrough
CT: control target
= control target key end

     0   :  { %10 = vsyncpa [#allocation3], 0  ;;  %s2250_s0 = inlined_call_operand.hbm [shape: f32[384,256], index: 0, kind: input, shape index: {}]   ;;  %s2251_s1 = inlined_call_operand.hbm [shape: bf16[256,256], index: 1, kind: input, shape index: {}]   ;;  %s2252_s2 = inlined_call_operand.vmem [shape: f32[1,256], index: 2, kind: input, shape index: {}]   ;;  %s2253_s3 = inlined_call_operand.hbm [shape: bf16[256,128], index: 3, kind: input, shape index: {}]   ;;  %s2254_s4 = inlined_call_operand.vmem [shape: f32[1,128], index: 4, kind: input, shape index: {}]   ;;  %s2255_s5 = inlined_call_operand.hbm [shape: f32[2,384], index: 5, kind: output, shape index: {}]  }
   0x1   :  { %12 = vsyncpa [#allocation3 + $0x1], 0 }
   0x2   :  { %13 = vsyncpa [#allocation6], 0 }
   0x3   :  { %14 = vsyncpa [#allocation4], 0 }
   0x4   :  { %16 = vsyncpa [#allocation4 + $0x1], 0  ;;  %s1875_s18 = smov 0   ;;  %s1877_s19 = smov 0  }
   0x5   :  { %s1879_s20 = smov 0   ;;  %s1881_s21 = smov 0  }
   0x6 LB: > { %s1896_s22 = sadd.s32 4294967295, %s1833_s21   ;;  %s1363_s23 = sadd.s32 4294967294, %s1833_s21   ;;  %s1833_s21 = sphi %s1881_s21, %s2272_s21   ;;  %s1829_s20 = sphi %s1879_s20, %s2271_s20   ;;  %s1825_s19 = sphi %s1877_s19, %s2270_s19   ;;  %s1821_s18 = sphi %s1875_s18, %s2269_s18  }
   0x7   : > { %s1900_s24 = sadd.s32 1, %s1833_s21   ;;  %s29_s25 = sadd.s32 1, %s1829_s20 }
   0x8   : > { %s26_s26 = ssub.s32 %s1833_s21, %s1900_s24  ;;  %p36_p0 = scmp.ne.s32.totalorder %s1829_s20, %s1825_s19 }
   0x9   : > { %p27_p1 = scmp.eq.s32.totalorder %s26_s26, 0  ;;  %p37_p2 = scmp.eq.s32.totalorder %s1833_s21, 0 }
   0xa   : > { %p42_p3 = scmp.ne.s32.totalorder %s1825_s19, %s1821_s18  ;;  %p2256_p4 = scmp.eq.s32.totalorder %s1896_s22, 0 }
   0xb   : > { %s1912_s27 = scalar_select %p27_p1, %s1829_s20, %s29_s25  }
   0xc   : > { %p1914_p5 = por %p37_p2, %p36_p0  ;;  %p1920_p6 = por %p2256_p4, %p42_p3 }
   0xd   : > { %p150_p7 = scmp.eq.s32.totalorder %s1896_s22, 1  ;;  %p156_p8 = scmp.eq.s32.totalorder %s1363_s23, 1 }
   0xe   : > { %s2259_s29 = scalar_select %p1920_p6, 1, 0 }
   0xf   : > { %p1364_p9 = scmp.ge.s32.totalorder %s1833_s21, 1  ;;  %p163_p10 = scmp.lt.s32.totalorder %s1833_s21, 3 }
  0x10   : > { %p1927_p11 = por %p150_p7, %p36_p0  ;;  %p1931_p12 = por %p156_p8, %p42_p3 }
  0x11   : > { %p1935_p13 = pnand %p1364_p9, %p163_p10  ;;  %s1835_s8 = smov [#allocation5]  }
  0x12   : > { %s2260_s30 = scalar_select %p1927_p11, 1, 0 }
  0x13   : > { %s2261_s6 = scalar_select %p1931_p12, 1, 0 }
  0x14   : > { %p1567_p1 = pneg %p1935_p13  ;;  %s175_s9 = sshll.u32 %s1835_s8, 4  ;;  %s176_s9 = int_to_ptr.vmem [resolvable:$true] %s175_s9 }
  0x15   : > { %s1836_s11 = smov [#allocation7]   ;;  %s1698_s13 = scalar_lea.vmem %s176_s9, 4096 }
  0x16   : > { %p1943_p2 = pnand %p1567_p1, %p2256_p4  ;;  %s191_s12 = sshll.u32 %s1836_s11, 4  ;;  %s192_s12 = int_to_ptr.vmem [resolvable:$true] %s191_s12 }
  0x17   : > { %p1699_p3 = scmp.ne.s32.totalorder %s176_s9, %s1698_s13  ;;  %p1706_p9 = scmp.lt.s32.totalorder %s176_s9, %s176_s9 }
  0x18   : > { %p1689_p0 = pneg %p1943_p2  ;;  %p1707_p10 = scmp.lt.s32.totalorder %s1698_s13, %s1698_s13 }
  0x1a   : > { %p1701_p7 = pnand %p1699_p3, %p1689_p0  ;;  %p1708_p12 = por %p1707_p10, %p1706_p9 }
  0x1c   : > { %p1702_p8 = pneg %p1701_p7 }
  0x1e   : > { %p1709_p1 = pnand %p1708_p12, %p1702_p8 }
  0x20   : > { %1712 = shalt.err (!%p1709_p1)
}
  0x21   : > { %s1837_s14 = smov 128   ;;  %s1838_s15 = smov 8  }
  0x22   : > { %1570 = dma.hbm_to_vmem [thread:$0]  (!%p1943_p2), %s2251_s1, 4096, %s176_s9, [#allocation6], %s1837_s14, %s1837_s14, %s1838_s15  }
  0x23   : > { %s1724_s23 = scalar_lea.vmem %s192_s12, 2048  ;;  %p1732_p11 = scmp.lt.s32.totalorder %s192_s12, %s192_s12 }
  0x24   : > { %p1725_p4 = scmp.ne.s32.totalorder %s192_s12, %s1724_s23  ;;  %p1733_p6 = scmp.lt.s32.totalorder %s1724_s23, %s1724_s23 }
  0x26   : > { %p1727_p3 = pnand %p1725_p4, %p1689_p0  ;;  %p1734_p9 = por %p1733_p6, %p1732_p11 }
  0x28   : > { %p1728_p7 = pneg %p1727_p3 }
  0x2a   : > { %p1735_p12 = pnand %p1734_p9, %p1728_p7 }
  0x2c   : > { %1738 = shalt.err (!%p1735_p12)
}
  0x2d   : > { %s1839_s25 = smov 64   ;;  %s1840_s26 = smov 4  }
  0x2e   : > { %1573 = dma.hbm_to_vmem [thread:$0]  (!%p1943_p2), %s2253_s3, 2048, %s192_s12, [#allocation6], %s1839_s25, %s1839_s25, %s1840_s26  }
  0x2f   : > { %p1367_p8 = scmp.ge.s32.totalorder %s1833_s21, 2 }
  0x31   : > { %204 = sbr.rel (%p1367_p8) target bundleno = 86 (0x56), region = 32 }
  0x36   : > { %207 = sbr.rel (!%p1914_p5) target bundleno = 86 (0x56), region = 36  ;;  %s208_s9 = sand.u32 (%p1914_p5), 1, %s1829_s20  }
  0x37   : > { %s1369_s13 = sshll.u32 (%p1914_p5), %s1833_s21, 5  ;;  %s1368_s14 = sshll.u32 (%p1914_p5), %s208_s9, 9 }
  0x38   : > { %s214_s15 = ssub.s32 (%p1914_p5), 48, %s1369_s13  ;;  %s1975_s16 = scalar_lea.sflag (%p1914_p5), [#allocation3], %s208_s9 }
  0x39   : > { %p215_p4 = scmp.lt.s32.totalorder (%p1914_p5), %s214_s15, 32  ;;  %s212_s17 = scalar_lea.vmem (%p1914_p5), [#allocation2], %s1368_s14 }
  0x3b   : > { %s2274_s15 = smov (!%p215_p4, %s214_s15), 32 }
  0x3c   : > { %s1972_s10 = sshll.u32 %s2274_s15, 8 }
  0x3d   : > { %s220_s12 = ssub.s32 8192, %s1972_s10 }
  0x3e   : > { %221 = vsyncadd %s1975_s16, %s220_s12  ;;  %p1372_p5 = scmp.ne.s32.totalorder %s1972_s10, 0  ;;  %s1443_s28 = sshll.u32 %s1833_s21, 13 }
  0x3f   : > { %s1983_s26 = scalar_lea.hbm %s2250_s0, %s1443_s28  ;;  %s227_s8 = sshll.u32 %s212_s17, 4  ;;  %s1985_s8 = int_to_ptr.vmem [resolvable:$true] %s227_s8 }
  0x40   : > { %s1739_s11 = scalar_lea.hbm %s1983_s26, %s1972_s10  ;;  %s1743_s14 = scalar_lea.hbm %s2250_s0, 12288 }
  0x41   : > { %p1740_p6 = scmp.ne.s32.totalorder %s1983_s26, %s1739_s11  ;;  %p1744_p0 = scmp.lt.s32.totalorder %s1983_s26, %s2250_s0 }
  0x42   : > { %p1745_p10 = scmp.lt.s32.totalorder %s1743_s14, %s1739_s11 }
  0x43   : > { %p1741_p11 = pnand %p1740_p6, %p1372_p5 }
  0x44   : > { %p1746_p1 = por %p1745_p10, %p1744_p0 }
  0x45   : > { %p1742_p2 = pneg %p1741_p11 }
  0x47   : > { %p1747_p3 = pnand %p1746_p1, %p1742_p2 }
  0x49   : > { %1750 = shalt.err (!%p1747_p3)
}
  0x4a   : > { %s1751_s17 = scalar_lea.vmem %s1985_s8, %s1972_s10  ;;  %s1841_s28 = smov [#allocation2]  }
  0x4b   : > { %p1752_p7 = scmp.ne.s32.totalorder %s1985_s8, %s1751_s17  ;;  %s1755_s23 = sshll.u32 %s1841_s28, 4  ;;  %s1756_s23 = int_to_ptr.vmem [resolvable:$false] %s1755_s23 }
  0x4c   : > { %s1757_s25 = scalar_lea.vmem %s1756_s23, 16384  ;;  %p1758_p4 = scmp.lt.s32.totalorder %s1985_s8, %s1756_s23 }
  0x4d   : > { %p1753_p9 = pnand %p1752_p7, %p1372_p5  ;;  %p1759_p6 = scmp.lt.s32.totalorder %s1757_s25, %s1751_s17 }
  0x4f   : > { %p1754_p12 = pneg %p1753_p9  ;;  %p1760_p11 = por %p1759_p6, %p1758_p4 }
  0x51   : > { %p1761_p0 = pnand %p1760_p11, %p1754_p12 }
  0x53   : > { %1764 = shalt.err (!%p1761_p0)
}
  0x54   : > { %s1842_s11 = smov 256   ;;  %s1843_s9 = smov 16  }
  0x55   : > { %233 = dma.hbm_to_vmem [thread:$0]  (%p1372_p5), %s1983_s26, %s1972_s10, %s1985_s8, %s1975_s16, %s1842_s11, %s1842_s11, %s1843_s9  }
  0x56 PF: > { %239 = sbr.rel (%p1935_p13) target bundleno = 783 (0x30f), region = 40  ;;  %s2014_s13 = sand.u32 (!%p1935_p13), 1, %s1825_s19  }
  0x57   : > { %s1378_s14 = sshll.u32 (!%p1935_p13), %s2014_s13, 9  ;;  %s242_s15 = scalar_lea.sflag (!%p1935_p13), [#allocation3], %s2014_s13 }
  0x58   : > { %s2018_s12 = scalar_lea.vmem (!%p1935_p13), [#allocation2], %s1378_s14  ;;  %p2264_p2 = scmp.ne.s32.totalorder (!%p1935_p13), %s2259_s29, 0 }
  0x5b   : > { %1808 = dma.done.wait (%p2264_p2), %s242_s15, 8192  }
  0x5c   : > { %1810 = vsyncadd (%p2264_p2), %s242_s15, 4294959104  ;;  %p2265_p5 = scmp.eq.s32.totalorder %s1896_s22, 0 }
  0x5e   : > { %1812 = dma.done.wait (%p2265_p5), [#allocation6], 6144   ;;  %p2266_p13 = pmov %p2265_p5 }
  0x5f   : > { %v1623_v0 = vld [vmem:[#allocation5 + $0x74] ss:$8 sps:$4 sm:$0xff]   ;;  %v1625_v1 = vld [vmem:[#allocation5 + $0x70] ss:$8 sps:$4 sm:$0xff]   ;;  %v1626_v2 = vld [vmem:[#allocation5 + $0x64] ss:$8 sps:$4 sm:$0xff]  }
  0x60   : > { %1814 = vsyncadd (%p2266_p13), [#allocation6], 4294961152  ;;  %592 = vmatprep.subr.bf16.mxu0 %v1623_v0  ;;  %v1628_v3 = vld [vmem:[#allocation5 + $0x60] ss:$8 sps:$4 sm:$0xff]   ;;  %v1629_v4 = vld [vmem:[#allocation5 + $0x54] ss:$8 sps:$4 sm:$0xff]  }
  0x61   : > { %593 = vmatpush1.bf16.msra.mxu0 %v1625_v1  ;;  %v1631_v5 = vld [vmem:[#allocation5 + $0x50] ss:$8 sps:$4 sm:$0xff]   ;;  %v1632_v6 = vld [vmem:[#allocation5 + $0x44] ss:$8 sps:$4 sm:$0xff]   ;;  %v1634_v7 = vld [vmem:[#allocation5 + $0x40] ss:$8 sps:$4 sm:$0xff]  }
  0x62   : > { %594 = vmatprep.subr.bf16.mxu0 %v1626_v2  ;;  %v1635_v8 = vld [vmem:[#allocation5 + $0x34] ss:$8 sps:$4 sm:$0xff]   ;;  %v1637_v9 = vld [vmem:[#allocation5 + $0x30] ss:$8 sps:$4 sm:$0xff]   ;;  %v1638_v10 = vld [vmem:[#allocation5 + $0x24] ss:$8 sps:$4 sm:$0xff]  }
  0x63   : > { %v1640_v11 = vld [vmem:[#allocation5 + $0x20] ss:$8 sps:$4 sm:$0xff]   ;;  %v1641_v12 = vld [vmem:[#allocation5 + $0x14] ss:$8 sps:$4 sm:$0xff]   ;;  %v1643_v16 = vld [vmem:[#allocation5 + $0x10] ss:$8 sps:$4 sm:$0xff]  }
  0x64   : > { %v293_v13 = vld [vmem:[%s2018_s12 + $0x8] sm:$0xff]  ;;  %v295_v14 = vld [vmem:[%s2018_s12 + $0x18] sm:$0xff]  ;;  %v1673_v36 = vld [vmem:[#allocation7 + $0x70] sm:$0xff]   ;;  %s1381_s26 = sshll.u32 %s2014_s13, 2  ;;  %s1254_s17 = scalar_lea.sflag [#allocation4], %s2014_s13 }
  0x65   : > { %595 = vmatpush1.bf16.msra.mxu0 %v1628_v3  ;;  %v357_v15 = vpack.c.bf16 %v295_v14, %v293_v13  ;;  %v1644_v17 = vld [vmem:[#allocation5 + $0x4] ss:$8 sps:$4 sm:$0xff]   ;;  %v1646_v18 = vld [vmem:[#allocation5] ss:$8 sps:$4 sm:$0xff]   ;;  %v1647_v19 = vld [vmem:[#allocation5 + $0xf4] ss:$8 sps:$4 sm:$0xff]  }
  0x66   : > { %596 = vmatprep.subr.bf16.mxu0 %v1629_v4  ;;  %v1649_v20 = vld [vmem:[#allocation5 + $0xf0] ss:$8 sps:$4 sm:$0xff]   ;;  %v1650_v21 = vld [vmem:[#allocation5 + $0xe4] ss:$8 sps:$4 sm:$0xff]   ;;  %v1652_v22 = vld [vmem:[#allocation5 + $0xe0] ss:$8 sps:$4 sm:$0xff]  }
  0x67   : > { %624 = vmatprep.mubr.bf16.mxu0 %v357_v15  ;;  %v1653_v23 = vld [vmem:[#allocation5 + $0xd4] ss:$8 sps:$4 sm:$0xff]   ;;  %v1655_v24 = vld [vmem:[#allocation5 + $0xd0] ss:$8 sps:$4 sm:$0xff]   ;;  %v1656_v25 = vld [vmem:[#allocation5 + $0xc4] ss:$8 sps:$4 sm:$0xff]  }
  0x68   : > { %v1658_v26 = vld [vmem:[#allocation5 + $0xc0] ss:$8 sps:$4 sm:$0xff]   ;;  %v1659_v27 = vld [vmem:[#allocation5 + $0xb4] ss:$8 sps:$4 sm:$0xff]   ;;  %v1661_v28 = vld [vmem:[#allocation5 + $0xb0] ss:$8 sps:$4 sm:$0xff]  }
  0x69   : > { %597 = vmatpush1.bf16.msra.mxu0 %v1631_v5  ;;  %v1662_v29 = vld [vmem:[#allocation5 + $0xa4] ss:$8 sps:$4 sm:$0xff]   ;;  %v1664_v30 = vld [vmem:[#allocation5 + $0xa0] ss:$8 sps:$4 sm:$0xff]   ;;  %v1665_v31 = vld [vmem:[#allocation5 + $0x94] ss:$8 sps:$4 sm:$0xff]  }
  0x6a   : > { %598 = vmatprep.subr.bf16.mxu0 %v1632_v6  ;;  %v1667_v32 = vld [vmem:[#allocation5 + $0x90] ss:$8 sps:$4 sm:$0xff]   ;;  %v1668_v33 = vld [vmem:[#allocation5 + $0x84] ss:$8 sps:$4 sm:$0xff]   ;;  %v1670_v37 = vld [vmem:[#allocation5 + $0x80] ss:$8 sps:$4 sm:$0xff]  }
  0x6b   : > { %v1671_v34 = vld [vmem:[#allocation7 + $0x78] sm:$0xff]   ;;  %v292_v38 = vld [vmem:[%s2018_s12] sm:$0xff]  ;;  %v294_v39 = vld [vmem:[%s2018_s12 + $0x10] sm:$0xff]  ;;  %s279_s8 = scalar_lea.vmem [#allocation8], %s1381_s26  ;;  %p2267_p10 = scmp.ne.s32.totalorder %s2260_s30, 0 }
  0x6c   : > { %v1672_v35 = vld [vmem:[#allocation7 + $0x38] sm:$0xff]   ;;  %v297_v40 = vld [vmem:[%s2018_s12 + $0x28] sm:$0xff]  ;;  %1445 = vmatprep.subr.bf16.mxu1 %v1671_v34  ;;  %v1674_v42 = vld [vmem:[#allocation7 + $0x30] sm:$0xff]   ;;  %v356_v43 = vpack.c.bf16 %v294_v39, %v292_v38  ;;  %s1433_s28 = sshll.u32 (%p2267_p10), %s1896_s22, 1 }
  0x6d   : > { %599 = vmatpush1.bf16.msra.mxu0 %v1634_v7  ;;  %v299_v41 = vld [vmem:[%s2018_s12 + $0x38] sm:$0xff]  ;;  %1446 = vmatpush3.bf16.msra.mxu1 %v1672_v35  ;;  %v1675_v44 = vld [vmem:[#allocation7 + $0x68] sm:$0xff]   ;;  %v1677_v47 = vld [vmem:[#allocation7 + $0x60] sm:$0xff]   ;;  %s1262_s23 = ssub.s32 (%p2267_p10), 3, %s1433_s28 }
  0x6e   : > { %600 = vmatprep.subr.bf16.mxu0 %v1635_v8  ;;  %1447 = vmatprep.subr.bf16.mxu1 %v1673_v36  ;;  %v359_v45 = vpack.c.bf16 %v299_v41, %v297_v40  ;;  %v1676_v46 = vld [vmem:[#allocation7 + $0x28] sm:$0xff]   ;;  %v296_v48 = vld [vmem:[%s2018_s12 + $0x20] sm:$0xff]  ;;  %v298_v49 = vld [vmem:[%s2018_s12 + $0x30] sm:$0xff]  ;;  %p1263_p1 = scmp.lt.s32.totalorder (%p2267_p10), %s1262_s23, 2 }
  0x6f   : > { %v301_v50 = vld [vmem:[%s2018_s12 + $0x48] sm:$0xff]  ;;  %v303_v51 = vld [vmem:[%s2018_s12 + $0x58] sm:$0xff]  ;;  %v1678_v52 = vld [vmem:[#allocation7 + $0x20] sm:$0xff]   ;;  %v358_v53 = vpack.c.bf16 %v298_v49, %v296_v48 }
  0x70   : > { %v1679_v54 = vld [vmem:[#allocation7 + $0x58] sm:$0xff]   ;;  %v361_v55 = vpack.c.bf16 %v303_v51, %v301_v50  ;;  %v300_v57 = vld [vmem:[%s2018_s12 + $0x40] sm:$0xff]  ;;  %v302_v58 = vld [vmem:[%s2018_s12 + $0x50] sm:$0xff] }
  0x71   : > { %601 = vmatpush1.bf16.msra.mxu0 %v1637_v9  ;;  %1448 = vmatpush3.bf16.msra.mxu1 %v1674_v42  ;;  %v1680_v56 = vld [vmem:[#allocation7 + $0x18] sm:$0xff]   ;;  %v305_v59 = vld [vmem:[%s2018_s12 + $0x68] sm:$0xff]  ;;  %v360_v61 = vpack.c.bf16 %v302_v58, %v300_v57  ;;  %v304_v63 = vld [vmem:[%s2018_s12 + $0x60] sm:$0xff] }
  0x72   : > { %602 = vmatprep.subr.bf16.mxu0 %v1638_v10  ;;  %1449 = vmatprep.subr.bf16.mxu1 %v1675_v44  ;;  %v307_v60 = vld [vmem:[%s2018_s12 + $0x78] sm:$0xff]  ;;  %v306_v0 = vld [vmem:[%s2018_s12 + $0x70] sm:$0xff]  ;;  %v309_v1 = vld [vmem:[%s2018_s12 + $0x88] sm:$0xff] }
  0x73   : > { %v363_v62 = vpack.c.bf16 %v307_v60, %v305_v59  ;;  %v311_v2 = vld [vmem:[%s2018_s12 + $0x98] sm:$0xff]  ;;  %v362_v3 = vpack.c.bf16 %v306_v0, %v304_v63  ;;  %v308_v5 = vld [vmem:[%s2018_s12 + $0x80] sm:$0xff]  ;;  %v310_v6 = vld [vmem:[%s2018_s12 + $0x90] sm:$0xff] }
  0x74   : > { %v365_v4 = vpack.c.bf16 %v311_v2, %v309_v1  ;;  %v313_v7 = vld [vmem:[%s2018_s12 + $0xa8] sm:$0xff]  ;;  %v315_v8 = vld [vmem:[%s2018_s12 + $0xb8] sm:$0xff]  ;;  %v364_v9 = vpack.c.bf16 %v310_v6, %v308_v5  ;;  %v1681_v35 = vld [vmem:[#allocation7 + $0x50] sm:$0xff]  }
  0x75   : > { %603 = vmatpush1.bf16.msra.mxu0 %v1640_v11  ;;  %1450 = vmatpush3.bf16.msra.mxu1 %v1676_v46  ;;  %v367_v10 = vpack.c.bf16 %v315_v8, %v313_v7  ;;  %v312_v11 = vld [vmem:[%s2018_s12 + $0xa0] sm:$0xff]  ;;  %v317_v13 = vld [vmem:[%s2018_s12 + $0xc8] sm:$0xff]  ;;  %v319_v14 = vld [vmem:[%s2018_s12 + $0xd8] sm:$0xff] }
  0x76   : > { %604 = vmatprep.subr.bf16.mxu0 %v1641_v12  ;;  %1451 = vmatprep.subr.bf16.mxu1 %v1677_v47  ;;  %v314_v12 = vld [vmem:[%s2018_s12 + $0xb0] sm:$0xff]  ;;  %v328_v36 = vld [vmem:[%s2018_s12 + $0x120] sm:$0xff]  ;;  %v333_v39 = vld [vmem:[%s2018_s12 + $0x148] sm:$0xff] }
  0x77   : > { %v366_v15 = vpack.c.bf16 %v314_v12, %v312_v11  ;;  %v1682_v38 = vld [vmem:[#allocation7 + $0x10] sm:$0xff]   ;;  %v335_v40 = vld [vmem:[%s2018_s12 + $0x158] sm:$0xff]  ;;  %v1683_v42 = vld [vmem:[#allocation7 + $0x48] sm:$0xff]  }
  0x78   : > { %v1684_v44 = vld [vmem:[#allocation7 + $0x8] sm:$0xff]   ;;  %v332_v46 = vld [vmem:[%s2018_s12 + $0x140] sm:$0xff]  ;;  %v334_v47 = vld [vmem:[%s2018_s12 + $0x150] sm:$0xff] }
  0x79   : > { %605 = vmatpush1.bf16.msra.mxu0 %v1643_v16  ;;  %1452 = vmatpush3.bf16.msra.mxu1 %v1678_v52  ;;  %v369_v16 = vpack.c.bf16 %v319_v14, %v317_v13  ;;  %v1686_v48 = vld [vmem:[#allocation7] sm:$0xff]   ;;  %v337_v49 = vld [vmem:[%s2018_s12 + $0x168] sm:$0xff]  ;;  %v339_v50 = vld [vmem:[%s2018_s12 + $0x178] sm:$0xff]  ;;  %v376_v51 = vpack.c.bf16 %v334_v47, %v332_v46 }
  0x7a   : > { %606 = vmatprep.subr.bf16.mxu0 %v1644_v17  ;;  %1453 = vmatprep.subr.bf16.mxu1 %v1679_v54  ;;  %v316_v17 = vld [vmem:[%s2018_s12 + $0xc0] sm:$0xff]  ;;  %v379_v52 = vpack.c.bf16 %v339_v50, %v337_v49  ;;  %v338_v54 = vld [vmem:[%s2018_s12 + $0x170] sm:$0xff] }
  0x7b   : > { %v340_v59 = vld [vmem:[%s2018_s12 + $0x180] sm:$0xff]  ;;  %v342_v60 = vld [vmem:[%s2018_s12 + $0x190] sm:$0xff] }
  0x7c   : > { %v380_v63 = vpack.c.bf16 %v342_v60, %v340_v59  ;;  %v344_v1 = vld [vmem:[%s2018_s12 + $0x1a0] sm:$0xff]  ;;  %v346_v2 = vld [vmem:[%s2018_s12 + $0x1b0] sm:$0xff] }
  0x7d   : > { %607 = vmatpush1.bf16.msra.mxu0 %v1646_v18  ;;  %1454 = vmatpush3.bf16.msra.mxu1 %v1680_v56  ;;  %v318_v18 = vld [vmem:[%s2018_s12 + $0xd0] sm:$0xff]  ;;  %v343_v56 = vld [vmem:[%s2018_s12 + $0x198] sm:$0xff]  ;;  %v382_v5 = vpack.c.bf16 %v346_v2, %v344_v1  ;;  %v348_v7 = vld [vmem:[%s2018_s12 + $0x1c0] sm:$0xff] }
  0x7e   : > { %608 = vmatprep.subr.bf16.mxu0 %v1647_v19  ;;  %v321_v19 = vld [vmem:[%s2018_s12 + $0xe8] sm:$0xff]  ;;  %1455 = vmatprep.subr.bf16.mxu1 %v1681_v35  ;;  %v350_v8 = vld [vmem:[%s2018_s12 + $0x1d0] sm:$0xff]  ;;  %v352_v13 = vld [vmem:[%s2018_s12 + $0x1e0] sm:$0xff] }
  0x7f   : > { %v384_v11 = vpack.c.bf16 %v350_v8, %v348_v7  ;;  %v354_v14 = vld [vmem:[%s2018_s12 + $0x1f0] sm:$0xff] }
  0x81   : > { %609 = vmatpush2.bf16.msra.mxu0 %v1649_v20  ;;  %v323_v20 = vld [vmem:[%s2018_s12 + $0xf8] sm:$0xff]  ;;  %1456 = vmatpush3.bf16.msra.mxu1 %v1682_v38 }
  0x82   : > { %610 = vmatprep.subr.bf16.mxu0 %v1650_v21  ;;  %v368_v21 = vpack.c.bf16 %v318_v18, %v316_v17  ;;  %1457 = vmatprep.subr.bf16.mxu1 %v1683_v42 }
  0x85   : > { %611 = vmatpush2.bf16.msra.mxu0 %v1652_v22  ;;  %v371_v22 = vpack.c.bf16 %v323_v20, %v321_v19  ;;  %1458 = vmatpush3.bf16.msra.mxu1 %v1684_v44  ;;  %v420_v20 = vld [vmem:[%s2252_s2] sm:$0x3] }
  0x86   : > { %612 = vmatprep.subr.bf16.mxu0 %v1653_v23  ;;  %v320_v23 = vld [vmem:[%s2018_s12 + $0xe0] sm:$0xff] }
  0x89   : > { %613 = vmatpush2.bf16.msra.mxu0 %v1655_v24  ;;  %v322_v24 = vld [vmem:[%s2018_s12 + $0xf0] sm:$0xff] }
  0x8a   : > { %614 = vmatprep.subr.bf16.mxu0 %v1656_v25  ;;  %v325_v25 = vld [vmem:[%s2018_s12 + $0x108] sm:$0xff] }
  0x8d   : > { %615 = vmatpush2.bf16.msra.mxu0 %v1658_v26  ;;  %v327_v26 = vld [vmem:[%s2018_s12 + $0x118] sm:$0xff] }
  0x8e   : > { %616 = vmatprep.subr.bf16.mxu0 %v1659_v27  ;;  %v370_v27 = vpack.c.bf16 %v322_v24, %v320_v23 }
  0x91   : > { %617 = vmatpush2.bf16.msra.mxu0 %v1661_v28  ;;  %v373_v28 = vpack.c.bf16 %v327_v26, %v325_v25 }
  0x92   : > { %618 = vmatprep.subr.bf16.mxu0 %v1662_v29  ;;  %v324_v29 = vld [vmem:[%s2018_s12 + $0x100] sm:$0xff] }
  0x95   : > { %619 = vmatpush2.bf16.msra.mxu0 %v1664_v30  ;;  %v326_v30 = vld [vmem:[%s2018_s12 + $0x110] sm:$0xff] }
  0x96   : > { %620 = vmatprep.subr.bf16.mxu0 %v1665_v31  ;;  %v329_v31 = vld [vmem:[%s2018_s12 + $0x128] sm:$0xff] }
  0x99   : > { %621 = vmatpush2.bf16.msra.mxu0 %v1667_v32  ;;  %v331_v32 = vld [vmem:[%s2018_s12 + $0x138] sm:$0xff] }
  0x9a   : > { %622 = vmatprep.subr.bf16.mxu0 %v1668_v33  ;;  %v372_v33 = vpack.c.bf16 %v326_v30, %v324_v29  ;;  %v375_v34 = vpack.c.bf16 %v331_v32, %v329_v31 }
  0x9d   : > { %623 = vmatpush2.bf16.msra.mxu0 %v1670_v37  ;;  %v330_v37 = vld [vmem:[%s2018_s12 + $0x130] sm:$0xff] }
  0x9e   : > { %v374_v41 = vpack.c.bf16 %v330_v37, %v328_v36 }
  0xa0   : > { %625 = vmatmul.mubr.bf16.vlgmr.msra.gmra.mxu0 %v356_v43  ;;  %v377_v43 = vpack.c.bf16 %v335_v40, %v333_v39 }
  0xa1   : > { %634 = vmatprep.mubr.bf16.mxu0 %v359_v45  ;;  %v1685_v45 = vld [vmem:[#allocation7 + $0x40] sm:$0xff]  }
  0xa2   : > { %1459 = vmatprep.subr.bf16.mxu1 %v1685_v45 }
  0xa3   : > { %1460 = vmatpush3.bf16.msra.mxu1 %v1686_v48 }
  0xa8   : > { %635 = vmatmul.mubr.bf16.gmra.mxu0 %v358_v53  ;;  %v336_v53 = vld [vmem:[%s2018_s12 + $0x160] sm:$0xff] }
  0xa9   : > { %644 = vmatprep.mubr.bf16.mxu0 %v361_v55  ;;  %v341_v55 = vld [vmem:[%s2018_s12 + $0x188] sm:$0xff]  ;;  %v378_v57 = vpack.c.bf16 %v338_v54, %v336_v53 }
  0xaa   : > { %v381_v58 = vpack.c.bf16 %v343_v56, %v341_v55 }
  0xb0   : > { %645 = vmatmul.mubr.bf16.gmra.mxu0 %v360_v61  ;;  %v345_v61 = vld [vmem:[%s2018_s12 + $0x1a8] sm:$0xff] }
  0xb1   : > { %654 = vmatprep.mubr.bf16.mxu0 %v363_v62  ;;  %v347_v62 = vld [vmem:[%s2018_s12 + $0x1b8] sm:$0xff] }
  0xb2   : > { %v383_v0 = vpack.c.bf16 %v347_v62, %v345_v61 }
  0xb8   : > { %655 = vmatmul.mubr.bf16.gmra.mxu0 %v362_v3  ;;  %v349_v3 = vld [vmem:[%s2018_s12 + $0x1c8] sm:$0xff] }
  0xb9   : > { %664 = vmatprep.mubr.bf16.mxu0 %v365_v4  ;;  %v351_v4 = vld [vmem:[%s2018_s12 + $0x1d8] sm:$0xff] }
  0xba   : > { %v385_v6 = vpack.c.bf16 %v351_v4, %v349_v3 }
  0xc0   : > { %665 = vmatmul.mubr.bf16.gmra.mxu0 %v364_v9  ;;  %v353_v9 = vld [vmem:[%s2018_s12 + $0x1e8] sm:$0xff] }
  0xc1   : > { %674 = vmatprep.mubr.bf16.mxu0 %v367_v10  ;;  %v355_v10 = vld [vmem:[%s2018_s12 + $0x1f8] sm:$0xff] }
  0xc2   : > { %v387_v12 = vpack.c.bf16 %v355_v10, %v353_v9 }
  0xc8   : > { %675 = vmatmul.mubr.bf16.gmra.mxu0 %v366_v15  ;;  %v386_v15 = vpack.c.bf16 %v354_v14, %v352_v13 }
  0xc9   : > { %684 = vmatprep.mubr.bf16.mxu0 %v369_v16  ;;  %v422_v16 = vlaneseq }
  0xcb   : > { %v423_v17 = vshrl.u32 %v422_v16, 7 }
  0xcd   : > { %v428_v18 = vsub.s32 1, %v423_v17  ;;  %v424_v19 = vsub.s32 0, %v423_v17 }
  0xcf   : > { %v2097_v23 = vrot.slane %v420_v20, %v424_v19 }
  0xd0   : > { %685 = vmatmul.mubr.bf16.gmra.mxu0 %v368_v21 }
  0xd1   : > { %694 = vmatprep.mubr.bf16.mxu0 %v371_v22  ;;  %v2095_v22 = vrot.slane %v420_v20, %v428_v18 }
  0xd8   : > { %695 = vmatmul.mubr.bf16.gmra.mxu0 %v370_v27 }
  0xd9   : > { %704 = vmatprep.mubr.bf16.mxu0 %v373_v28 }
  0xe0   : > { %705 = vmatmul.mubr.bf16.gmra.mxu0 %v372_v33 }
  0xe1   : > { %714 = vmatprep.mubr.bf16.mxu0 %v375_v34 }
  0xe8   : > { %715 = vmatmul.mubr.bf16.gmra.mxu0 %v374_v41 }
  0xe9   : > { %724 = vmatprep.mubr.bf16.mxu0 %v377_v43 }
  0xf0   : > { %725 = vmatmul.mubr.bf16.gmra.mxu0 %v376_v51 }
  0xf1   : > { %734 = vmatprep.mubr.bf16.mxu0 %v379_v52 }
  0xf8   : > { %735 = vmatmul.mubr.bf16.gmra.mxu0 %v378_v57 }
  0xf9   : > { %744 = vmatprep.mubr.bf16.mxu0 %v381_v58 }
 0x100   : > { %745 = vmatmul.mubr.bf16.gmra.mxu0 %v380_v63 }
 0x101   : > { %754 = vmatprep.mubr.bf16.mxu0 %v383_v0 }
 0x108   : > { %755 = vmatmul.mubr.bf16.gmra.mxu0 %v382_v5 }
 0x109   : > { %764 = vmatprep.mubr.bf16.mxu0 %v385_v6 }
 0x110   : > { %765 = vmatmul.mubr.bf16.gmra.mxu0 %v384_v11 }
 0x111   : > { %774 = vmatprep.mubr.bf16.mxu0 %v387_v12 }
 0x118   : > { %775 = vmatmul.mubr.bf16.gmra.mxu0 %v386_v15 }
 0x160   : > { %v626_v21 = vpop.f32.mrf.mxu0 }
 0x161   : > { %v627_v28 = vadd.f32 %v626_v21, %v2097_v23 }
 0x162   : > { %v628_v24 = vpop.f32.mrf.mxu0 }
 0x163   : > { %v629_v26 = vadd.f32 %v628_v24, %v2095_v22  ;;  %v785_v35 = vmax.f32 %v627_v28, 0.0 }
 0x164   : > { %v630_v25 = vpop.f32.mrf.mxu0 }
 0x165   : > { %v631_v27 = vadd.f32 %v630_v25, %v2097_v23  ;;  %v786_v33 = vmax.f32 %v629_v26, 0.0 }
 0x166   : > { %v632_v29 = vpop.f32.mrf.mxu0 }
 0x167   : > { %v633_v30 = vadd.f32 %v632_v29, %v2095_v22  ;;  %v787_v31 = vmax.f32 %v631_v27, 0.0 }
 0x168   : > { %v636_v32 = vpop.f32.mrf.mxu0 }
 0x169   : > { %v788_v34 = vmax.f32 %v633_v30, 0.0  ;;  %v849_v38 = vpack.c.bf16 %v787_v31, %v785_v35  ;;  %v637_v42 = vadd.f32 %v636_v32, %v2097_v23 }
 0x16a   : > { %v638_v36 = vpop.f32.mrf.mxu0 }
 0x16b   : > { %v850_v37 = vpack.c.bf16 %v788_v34, %v786_v33  ;;  %v639_v40 = vadd.f32 %v638_v36, %v2095_v22  ;;  %v789_v49 = vmax.f32 %v637_v42, 0.0 }
 0x16c   : > { %v640_v39 = vpop.f32.mrf.mxu0 }
 0x16d   : > { %v641_v41 = vadd.f32 %v640_v39, %v2097_v23  ;;  %1048 = vmatprep.mubr.bf16.mxu1 %v850_v37  ;;  %v790_v47 = vmax.f32 %v639_v40, 0.0 }
 0x16e   : > { %v642_v43 = vpop.f32.mrf.mxu0  ;;  %1049 = vmatmul.mubr.bf16.vlgmr.msra.gmra.mxu1 %v849_v38 }
 0x16f   : > { %v643_v44 = vadd.f32 %v642_v43, %v2095_v22  ;;  %v791_v45 = vmax.f32 %v641_v41, 0.0 }
 0x170   : > { %v646_v46 = vpop.f32.mrf.mxu0 }
 0x171   : > { %v792_v48 = vmax.f32 %v643_v44, 0.0  ;;  %v851_v52 = vpack.c.bf16 %v791_v45, %v789_v49  ;;  %v647_v56 = vadd.f32 %v646_v46, %v2097_v23 }
 0x172   : > { %v648_v50 = vpop.f32.mrf.mxu0 }
 0x173   : > { %v852_v51 = vpack.c.bf16 %v792_v48, %v790_v47  ;;  %v649_v54 = vadd.f32 %v648_v50, %v2095_v22  ;;  %v793_v63 = vmax.f32 %v647_v56, 0.0 }
 0x174   : > { %v650_v53 = vpop.f32.mrf.mxu0 }
 0x175   : > { %v651_v55 = vadd.f32 %v650_v53, %v2097_v23  ;;  %1056 = vmatprep.mubr.bf16.mxu1 %v852_v51  ;;  %v794_v61 = vmax.f32 %v649_v54, 0.0 }
 0x176   : > { %v652_v57 = vpop.f32.mrf.mxu0  ;;  %1057 = vmatmul.mubr.bf16.gmra.mxu1 %v851_v52 }
 0x177   : > { %v653_v58 = vadd.f32 %v652_v57, %v2095_v22  ;;  %v795_v59 = vmax.f32 %v651_v55, 0.0 }
 0x178   : > { %v656_v60 = vpop.f32.mrf.mxu0 }
 0x179   : > { %v796_v62 = vmax.f32 %v653_v58, 0.0  ;;  %v853_v2 = vpack.c.bf16 %v795_v59, %v793_v63  ;;  %v657_v6 = vadd.f32 %v656_v60, %v2097_v23 }
 0x17a   : > { %v658_v0 = vpop.f32.mrf.mxu0 }
 0x17b   : > { %v854_v1 = vpack.c.bf16 %v796_v62, %v794_v61  ;;  %v659_v4 = vadd.f32 %v658_v0, %v2095_v22  ;;  %v797_v13 = vmax.f32 %v657_v6, 0.0 }
 0x17c   : > { %v660_v3 = vpop.f32.mrf.mxu0 }
 0x17d   : > { %v661_v5 = vadd.f32 %v660_v3, %v2097_v23  ;;  %1064 = vmatprep.mubr.bf16.mxu1 %v854_v1  ;;  %v798_v11 = vmax.f32 %v659_v4, 0.0 }
 0x17e   : > { %v662_v7 = vpop.f32.mrf.mxu0  ;;  %1065 = vmatmul.mubr.bf16.gmra.mxu1 %v853_v2 }
 0x17f   : > { %v663_v8 = vadd.f32 %v662_v7, %v2095_v22  ;;  %v799_v9 = vmax.f32 %v661_v5, 0.0 }
 0x180   : > { %v666_v10 = vpop.f32.mrf.mxu0 }
 0x181   : > { %v800_v12 = vmax.f32 %v663_v8, 0.0  ;;  %v855_v16 = vpack.c.bf16 %v799_v9, %v797_v13  ;;  %v667_v20 = vadd.f32 %v666_v10, %v2097_v23 }
 0x182   : > { %v668_v14 = vpop.f32.mrf.mxu0 }
 0x183   : > { %v856_v15 = vpack.c.bf16 %v800_v12, %v798_v11  ;;  %v669_v18 = vadd.f32 %v668_v14, %v2095_v22  ;;  %v801_v29 = vmax.f32 %v667_v20, 0.0 }
 0x184   : > { %v670_v17 = vpop.f32.mrf.mxu0 }
 0x185   : > { %v671_v19 = vadd.f32 %v670_v17, %v2097_v23  ;;  %1072 = vmatprep.mubr.bf16.mxu1 %v856_v15  ;;  %v802_v27 = vmax.f32 %v669_v18, 0.0 }
 0x186   : > { %v672_v21 = vpop.f32.mrf.mxu0  ;;  %1073 = vmatmul.mubr.bf16.gmra.mxu1 %v855_v16 }
 0x187   : > { %v673_v24 = vadd.f32 %v672_v21, %v2095_v22  ;;  %v803_v25 = vmax.f32 %v671_v19, 0.0 }
 0x188   : > { %v676_v26 = vpop.f32.mrf.mxu0 }
 0x189   : > { %v804_v28 = vmax.f32 %v673_v24, 0.0  ;;  %v857_v32 = vpack.c.bf16 %v803_v25, %v801_v29  ;;  %v677_v36 = vadd.f32 %v676_v26, %v2097_v23 }
 0x18a   : > { %v678_v30 = vpop.f32.mrf.mxu0 }
 0x18b   : > { %v858_v31 = vpack.c.bf16 %v804_v28, %v802_v27  ;;  %v679_v34 = vadd.f32 %v678_v30, %v2095_v22  ;;  %v805_v43 = vmax.f32 %v677_v36, 0.0 }
 0x18c   : > { %v680_v33 = vpop.f32.mrf.mxu0 }
 0x18d   : > { %v681_v35 = vadd.f32 %v680_v33, %v2097_v23  ;;  %1080 = vmatprep.mubr.bf16.mxu1 %v858_v31  ;;  %v806_v41 = vmax.f32 %v679_v34, 0.0 }
 0x18e   : > { %v682_v37 = vpop.f32.mrf.mxu0  ;;  %1081 = vmatmul.mubr.bf16.gmra.mxu1 %v857_v32 }
 0x18f   : > { %v683_v38 = vadd.f32 %v682_v37, %v2095_v22  ;;  %v807_v39 = vmax.f32 %v681_v35, 0.0 }
 0x190   : > { %v686_v40 = vpop.f32.mrf.mxu0 }
 0x191   : > { %v808_v42 = vmax.f32 %v683_v38, 0.0  ;;  %v859_v46 = vpack.c.bf16 %v807_v39, %v805_v43  ;;  %v687_v50 = vadd.f32 %v686_v40, %v2097_v23 }
 0x192   : > { %v688_v44 = vpop.f32.mrf.mxu0 }
 0x193   : > { %v860_v45 = vpack.c.bf16 %v808_v42, %v806_v41  ;;  %v689_v48 = vadd.f32 %v688_v44, %v2095_v22  ;;  %v809_v57 = vmax.f32 %v687_v50, 0.0 }
 0x194   : > { %v690_v47 = vpop.f32.mrf.mxu0 }
 0x195   : > { %v691_v49 = vadd.f32 %v690_v47, %v2097_v23  ;;  %1088 = vmatprep.mubr.bf16.mxu1 %v860_v45  ;;  %v810_v55 = vmax.f32 %v689_v48, 0.0 }
 0x196   : > { %v692_v51 = vpop.f32.mrf.mxu0  ;;  %1089 = vmatmul.mubr.bf16.gmra.mxu1 %v859_v46 }
 0x197   : > { %v693_v52 = vadd.f32 %v692_v51, %v2095_v22  ;;  %v811_v53 = vmax.f32 %v691_v49, 0.0 }
 0x198   : > { %v696_v54 = vpop.f32.mrf.mxu0 }
 0x199   : > { %v812_v56 = vmax.f32 %v693_v52, 0.0  ;;  %v861_v60 = vpack.c.bf16 %v811_v53, %v809_v57  ;;  %v697_v0 = vadd.f32 %v696_v54, %v2097_v23 }
 0x19a   : > { %v698_v58 = vpop.f32.mrf.mxu0 }
 0x19b   : > { %v862_v59 = vpack.c.bf16 %v812_v56, %v810_v55  ;;  %v699_v62 = vadd.f32 %v698_v58, %v2095_v22  ;;  %v813_v7 = vmax.f32 %v697_v0, 0.0 }
 0x19c   : > { %v700_v61 = vpop.f32.mrf.mxu0 }
 0x19d   : > { %v701_v63 = vadd.f32 %v700_v61, %v2097_v23  ;;  %1096 = vmatprep.mubr.bf16.mxu1 %v862_v59  ;;  %v814_v5 = vmax.f32 %v699_v62, 0.0 }
 0x19e   : > { %v702_v1 = vpop.f32.mrf.mxu0  ;;  %1097 = vmatmul.mubr.bf16.gmra.mxu1 %v861_v60 }
 0x19f   : > { %v703_v2 = vadd.f32 %v702_v1, %v2095_v22  ;;  %v815_v3 = vmax.f32 %v701_v63, 0.0 }
 0x1a0   : > { %v706_v4 = vpop.f32.mrf.mxu0 }
 0x1a1   : > { %v816_v6 = vmax.f32 %v703_v2, 0.0  ;;  %v863_v10 = vpack.c.bf16 %v815_v3, %v813_v7  ;;  %v707_v14 = vadd.f32 %v706_v4, %v2097_v23 }
 0x1a2   : > { %v708_v8 = vpop.f32.mrf.mxu0 }
 0x1a3   : > { %v864_v9 = vpack.c.bf16 %v816_v6, %v814_v5  ;;  %v709_v12 = vadd.f32 %v708_v8, %v2095_v22  ;;  %v817_v21 = vmax.f32 %v707_v14, 0.0 }
 0x1a4   : > { %v710_v11 = vpop.f32.mrf.mxu0 }
 0x1a5   : > { %v711_v13 = vadd.f32 %v710_v11, %v2097_v23  ;;  %1104 = vmatprep.mubr.bf16.mxu1 %v864_v9  ;;  %v818_v19 = vmax.f32 %v709_v12, 0.0 }
 0x1a6   : > { %v712_v15 = vpop.f32.mrf.mxu0  ;;  %1105 = vmatmul.mubr.bf16.gmra.mxu1 %v863_v10 }
 0x1a7   : > { %v713_v16 = vadd.f32 %v712_v15, %v2095_v22  ;;  %v819_v17 = vmax.f32 %v711_v13, 0.0 }
 0x1a8   : > { %v716_v18 = vpop.f32.mrf.mxu0 }
 0x1a9   : > { %v820_v20 = vmax.f32 %v713_v16, 0.0  ;;  %v865_v26 = vpack.c.bf16 %v819_v17, %v817_v21  ;;  %v717_v30 = vadd.f32 %v716_v18, %v2097_v23 }
 0x1aa   : > { %v718_v24 = vpop.f32.mrf.mxu0 }
 0x1ab   : > { %v866_v25 = vpack.c.bf16 %v820_v20, %v818_v19  ;;  %v719_v28 = vadd.f32 %v718_v24, %v2095_v22  ;;  %v821_v37 = vmax.f32 %v717_v30, 0.0 }
 0x1ac   : > { %v720_v27 = vpop.f32.mrf.mxu0 }
 0x1ad   : > { %v721_v29 = vadd.f32 %v720_v27, %v2097_v23  ;;  %1112 = vmatprep.mubr.bf16.mxu1 %v866_v25  ;;  %v822_v35 = vmax.f32 %v719_v28, 0.0 }
 0x1ae   : > { %v722_v31 = vpop.f32.mrf.mxu0  ;;  %1113 = vmatmul.mubr.bf16.gmra.mxu1 %v865_v26 }
 0x1af   : > { %v723_v32 = vadd.f32 %v722_v31, %v2095_v22  ;;  %v823_v33 = vmax.f32 %v721_v29, 0.0 }
 0x1b0   : > { %v726_v34 = vpop.f32.mrf.mxu0 }
 0x1b1   : > { %v824_v36 = vmax.f32 %v723_v32, 0.0  ;;  %v867_v40 = vpack.c.bf16 %v823_v33, %v821_v37  ;;  %v727_v44 = vadd.f32 %v726_v34, %v2097_v23 }
 0x1b2   : > { %v728_v38 = vpop.f32.mrf.mxu0 }
 0x1b3   : > { %v868_v39 = vpack.c.bf16 %v824_v36, %v822_v35  ;;  %v729_v42 = vadd.f32 %v728_v38, %v2095_v22  ;;  %v825_v51 = vmax.f32 %v727_v44, 0.0 }
 0x1b4   : > { %v730_v41 = vpop.f32.mrf.mxu0 }
 0x1b5   : > { %v731_v43 = vadd.f32 %v730_v41, %v2097_v23  ;;  %1120 = vmatprep.mubr.bf16.mxu1 %v868_v39  ;;  %v826_v49 = vmax.f32 %v729_v42, 0.0 }
 0x1b6   : > { %v732_v45 = vpop.f32.mrf.mxu0  ;;  %1121 = vmatmul.mubr.bf16.gmra.mxu1 %v867_v40 }
 0x1b7   : > { %v733_v46 = vadd.f32 %v732_v45, %v2095_v22  ;;  %v827_v47 = vmax.f32 %v731_v43, 0.0 }
 0x1b8   : > { %v736_v48 = vpop.f32.mrf.mxu0 }
 0x1b9   : > { %v828_v50 = vmax.f32 %v733_v46, 0.0  ;;  %v869_v54 = vpack.c.bf16 %v827_v47, %v825_v51  ;;  %v737_v58 = vadd.f32 %v736_v48, %v2097_v23 }
 0x1ba   : > { %v738_v52 = vpop.f32.mrf.mxu0 }
 0x1bb   : > { %v870_v53 = vpack.c.bf16 %v828_v50, %v826_v49  ;;  %v739_v56 = vadd.f32 %v738_v52, %v2095_v22  ;;  %v829_v1 = vmax.f32 %v737_v58, 0.0 }
 0x1bc   : > { %v740_v55 = vpop.f32.mrf.mxu0 }
 0x1bd   : > { %v741_v57 = vadd.f32 %v740_v55, %v2097_v23  ;;  %1128 = vmatprep.mubr.bf16.mxu1 %v870_v53  ;;  %v830_v63 = vmax.f32 %v739_v56, 0.0 }
 0x1be   : > { %v742_v59 = vpop.f32.mrf.mxu0  ;;  %1129 = vmatmul.mubr.bf16.gmra.mxu1 %v869_v54 }
 0x1bf   : > { %v743_v60 = vadd.f32 %v742_v59, %v2095_v22  ;;  %v831_v61 = vmax.f32 %v741_v57, 0.0 }
 0x1c0   : > { %v746_v62 = vpop.f32.mrf.mxu0 }
 0x1c1   : > { %v832_v0 = vmax.f32 %v743_v60, 0.0  ;;  %v871_v4 = vpack.c.bf16 %v831_v61, %v829_v1  ;;  %v747_v8 = vadd.f32 %v746_v62, %v2097_v23 }
 0x1c2   : > { %v748_v2 = vpop.f32.mrf.mxu0 }
 0x1c3   : > { %v872_v3 = vpack.c.bf16 %v832_v0, %v830_v63  ;;  %v749_v6 = vadd.f32 %v748_v2, %v2095_v22  ;;  %v833_v15 = vmax.f32 %v747_v8, 0.0  ;;  %v2166_v63 = vld [vmem:[%s2254_s4] ss:$0 sm:$0xff] }
 0x1c4   : > { %v750_v5 = vpop.f32.mrf.mxu0 }
 0x1c5   : > { %v751_v7 = vadd.f32 %v750_v5, %v2097_v23  ;;  %1136 = vmatprep.mubr.bf16.mxu1 %v872_v3  ;;  %v834_v13 = vmax.f32 %v749_v6, 0.0 }
 0x1c6   : > { %v752_v9 = vpop.f32.mrf.mxu0  ;;  %1137 = vmatmul.mubr.bf16.gmra.mxu1 %v871_v4 }
 0x1c7   : > { %v753_v10 = vadd.f32 %v752_v9, %v2095_v22  ;;  %v835_v11 = vmax.f32 %v751_v7, 0.0 }
 0x1c8   : > { %v756_v12 = vpop.f32.mrf.mxu0 }
 0x1c9   : > { %v836_v14 = vmax.f32 %v753_v10, 0.0  ;;  %v873_v18 = vpack.c.bf16 %v835_v11, %v833_v15  ;;  %v757_v24 = vadd.f32 %v756_v12, %v2097_v23 }
 0x1ca   : > { %v758_v16 = vpop.f32.mrf.mxu0 }
 0x1cb   : > { %v874_v17 = vpack.c.bf16 %v836_v14, %v834_v13  ;;  %v759_v20 = vadd.f32 %v758_v16, %v2095_v22  ;;  %v837_v31 = vmax.f32 %v757_v24, 0.0 }
 0x1cc   : > { %v760_v19 = vpop.f32.mrf.mxu0 }
 0x1cd   : > { %v761_v21 = vadd.f32 %v760_v19, %v2097_v23  ;;  %1144 = vmatprep.mubr.bf16.mxu1 %v874_v17  ;;  %v838_v29 = vmax.f32 %v759_v20, 0.0 }
 0x1ce   : > { %v762_v25 = vpop.f32.mrf.mxu0  ;;  %1145 = vmatmul.mubr.bf16.gmra.mxu1 %v873_v18 }
 0x1cf   : > { %v763_v26 = vadd.f32 %v762_v25, %v2095_v22  ;;  %v839_v27 = vmax.f32 %v761_v21, 0.0 }
 0x1d0   : > { %v766_v28 = vpop.f32.mrf.mxu0 }
 0x1d1   : > { %v840_v30 = vmax.f32 %v763_v26, 0.0  ;;  %v875_v34 = vpack.c.bf16 %v839_v27, %v837_v31  ;;  %v767_v38 = vadd.f32 %v766_v28, %v2097_v23 }
 0x1d2   : > { %v768_v32 = vpop.f32.mrf.mxu0 }
 0x1d3   : > { %v876_v33 = vpack.c.bf16 %v840_v30, %v838_v29  ;;  %v769_v36 = vadd.f32 %v768_v32, %v2095_v22  ;;  %v841_v45 = vmax.f32 %v767_v38, 0.0 }
 0x1d4   : > { %v770_v35 = vpop.f32.mrf.mxu0 }
 0x1d5   : > { %v771_v37 = vadd.f32 %v770_v35, %v2097_v23  ;;  %1152 = vmatprep.mubr.bf16.mxu1 %v876_v33  ;;  %v842_v43 = vmax.f32 %v769_v36, 0.0 }
 0x1d6   : > { %v772_v39 = vpop.f32.mrf.mxu0  ;;  %1153 = vmatmul.mubr.bf16.gmra.mxu1 %v875_v34 }
 0x1d7   : > { %v773_v40 = vadd.f32 %v772_v39, %v2095_v22  ;;  %v843_v41 = vmax.f32 %v771_v37, 0.0 }
 0x1d8   : > { %v776_v42 = vpop.f32.mrf.mxu0 }
 0x1d9   : > { %v844_v44 = vmax.f32 %v773_v40, 0.0  ;;  %v877_v48 = vpack.c.bf16 %v843_v41, %v841_v45  ;;  %v777_v52 = vadd.f32 %v776_v42, %v2097_v23 }
 0x1da   : > { %v778_v46 = vpop.f32.mrf.mxu0 }
 0x1db   : > { %v878_v47 = vpack.c.bf16 %v844_v44, %v842_v43  ;;  %v779_v50 = vadd.f32 %v778_v46, %v2095_v22  ;;  %v845_v58 = vmax.f32 %v777_v52, 0.0 }
 0x1dc   : > { %v780_v49 = vpop.f32.mrf.mxu0 }
 0x1dd   : > { %v781_v51 = vadd.f32 %v780_v49, %v2097_v23  ;;  %1160 = vmatprep.mubr.bf16.mxu1 %v878_v47  ;;  %v846_v56 = vmax.f32 %v779_v50, 0.0 }
 0x1de   : > { %v782_v53 = vpop.f32.mrf.mxu0  ;;  %1161 = vmatmul.mubr.bf16.gmra.mxu1 %v877_v48 }
 0x1df   : > { %v783_v54 = vadd.f32 %v782_v53, %v2095_v22  ;;  %v847_v55 = vmax.f32 %v781_v51, 0.0 }
 0x1e1   : > { %v848_v57 = vmax.f32 %v783_v54, 0.0  ;;  %v879_v60 = vpack.c.bf16 %v847_v55, %v845_v58 }
 0x1e3   : > { %v880_v59 = vpack.c.bf16 %v848_v57, %v846_v56 }
 0x1e5   : > { %1168 = vmatprep.mubr.bf16.mxu1 %v880_v59 }
 0x1e6   : > { %1169 = vmatmul.mubr.bf16.gmra.mxu1 %v879_v60 }
 0x22e   : > { %v1461_v61 = vpop.f32.mrf.mxu1 }
 0x230   : > { %v1462_v62 = vpop.f32.mrf.mxu1 }
 0x231   : > { %v1463_v23 = vadd.f32 %v1462_v62, %v1461_v61 }
 0x232   : > { %v1464_v0 = vpop.f32.mrf.mxu1 }
 0x233   : > { %v1051_v1 = vadd.f32 %v1463_v23, %v2166_v63 }
 0x234   : > { %v1465_v22 = vpop.f32.mrf.mxu1 }
 0x235   : > { %v1466_v2 = vadd.f32 %v1465_v22, %v1464_v0  ;;  %1177 = vxpose.xlu0.b32.start [1/16] (narrow) %v1051_v1, 8 }
 0x236   : > { %v1467_v3 = vpop.f32.mrf.mxu1 }
 0x237   : > { %v1054_v4 = vadd.f32 %v1466_v2, %v2166_v63 }
 0x238   : > { %v1468_v5 = vpop.f32.mrf.mxu1 }
 0x239   : > { %v1469_v6 = vadd.f32 %v1468_v5, %v1467_v3  ;;  %1178 = vxpose.xlu0.b32.cont [2/16] (narrow) %v1054_v4, 8 }
 0x23a   : > { %v1470_v7 = vpop.f32.mrf.mxu1 }
 0x23b   : > { %v1059_v8 = vadd.f32 %v1469_v6, %v2166_v63 }
 0x23c   : > { %v1471_v9 = vpop.f32.mrf.mxu1 }
 0x23d   : > { %v1472_v10 = vadd.f32 %v1471_v9, %v1470_v7  ;;  %1179 = vxpose.xlu0.b32.cont [3/16] (narrow) %v1059_v8, 8 }
 0x23e   : > { %v1473_v11 = vpop.f32.mrf.mxu1 }
 0x23f   : > { %v1062_v12 = vadd.f32 %v1472_v10, %v2166_v63 }
 0x240   : > { %v1474_v13 = vpop.f32.mrf.mxu1 }
 0x241   : > { %v1475_v14 = vadd.f32 %v1474_v13, %v1473_v11  ;;  %1180 = vxpose.xlu0.b32.cont [4/16] (narrow) %v1062_v12, 8 }
 0x242   : > { %v1476_v15 = vpop.f32.mrf.mxu1 }
 0x243   : > { %v1067_v16 = vadd.f32 %v1475_v14, %v2166_v63 }
 0x244   : > { %v1477_v17 = vpop.f32.mrf.mxu1 }
 0x245   : > { %v1478_v18 = vadd.f32 %v1477_v17, %v1476_v15  ;;  %1181 = vxpose.xlu0.b32.cont [5/16] (narrow) %v1067_v16, 8 }
 0x246   : > { %v1479_v19 = vpop.f32.mrf.mxu1 }
 0x247   : > { %v1070_v20 = vadd.f32 %v1478_v18, %v2166_v63 }
 0x248   : > { %v1480_v21 = vpop.f32.mrf.mxu1 }
 0x249   : > { %v1481_v24 = vadd.f32 %v1480_v21, %v1479_v19  ;;  %1182 = vxpose.xlu0.b32.cont [6/16] (narrow) %v1070_v20, 8 }
 0x24a   : > { %v1482_v25 = vpop.f32.mrf.mxu1 }
 0x24b   : > { %v1075_v26 = vadd.f32 %v1481_v24, %v2166_v63 }
 0x24c   : > { %v1483_v27 = vpop.f32.mrf.mxu1 }
 0x24d   : > { %v1484_v28 = vadd.f32 %v1483_v27, %v1482_v25  ;;  %1183 = vxpose.xlu0.b32.cont [7/16] (narrow) %v1075_v26, 8 }
 0x24e   : > { %v1485_v29 = vpop.f32.mrf.mxu1 }
 0x24f   : > { %v1078_v30 = vadd.f32 %v1484_v28, %v2166_v63 }
 0x250   : > { %v1486_v31 = vpop.f32.mrf.mxu1 }
 0x251   : > { %v1487_v32 = vadd.f32 %v1486_v31, %v1485_v29  ;;  %1184 = vxpose.xlu0.b32.cont [8/16] (narrow) %v1078_v30, 8 }
 0x252   : > { %v1488_v33 = vpop.f32.mrf.mxu1 }
 0x253   : > { %v1083_v34 = vadd.f32 %v1487_v32, %v2166_v63 }
 0x254   : > { %v1489_v35 = vpop.f32.mrf.mxu1 }
 0x255   : > { %v1490_v36 = vadd.f32 %v1489_v35, %v1488_v33  ;;  %1185 = vxpose.xlu0.b32.cont [9/16] (narrow) %v1083_v34, 8 }
 0x256   : > { %v1491_v37 = vpop.f32.mrf.mxu1 }
 0x257   : > { %v1086_v38 = vadd.f32 %v1490_v36, %v2166_v63 }
 0x258   : > { %v1492_v39 = vpop.f32.mrf.mxu1 }
 0x259   : > { %v1493_v40 = vadd.f32 %v1492_v39, %v1491_v37  ;;  %1186 = vxpose.xlu0.b32.cont [10/16] (narrow) %v1086_v38, 8 }
 0x25a   : > { %v1494_v41 = vpop.f32.mrf.mxu1 }
 0x25b   : > { %v1091_v42 = vadd.f32 %v1493_v40, %v2166_v63 }
 0x25c   : > { %v1495_v43 = vpop.f32.mrf.mxu1 }
 0x25d   : > { %v1496_v44 = vadd.f32 %v1495_v43, %v1494_v41  ;;  %1187 = vxpose.xlu0.b32.cont [11/16] (narrow) %v1091_v42, 8 }
 0x25e   : > { %v1497_v45 = vpop.f32.mrf.mxu1 }
 0x25f   : > { %v1094_v46 = vadd.f32 %v1496_v44, %v2166_v63 }
 0x260   : > { %v1498_v47 = vpop.f32.mrf.mxu1 }
 0x261   : > { %v1499_v48 = vadd.f32 %v1498_v47, %v1497_v45  ;;  %1188 = vxpose.xlu0.b32.cont [12/16] (narrow) %v1094_v46, 8 }
 0x262   : > { %v1500_v49 = vpop.f32.mrf.mxu1 }
 0x263   : > { %v1099_v50 = vadd.f32 %v1499_v48, %v2166_v63 }
 0x264   : > { %v1501_v51 = vpop.f32.mrf.mxu1 }
 0x265   : > { %v1502_v52 = vadd.f32 %v1501_v51, %v1500_v49  ;;  %1189 = vxpose.xlu0.b32.cont [13/16] (narrow) %v1099_v50, 8 }
 0x266   : > { %v1503_v53 = vpop.f32.mrf.mxu1 }
 0x267   : > { %v1102_v54 = vadd.f32 %v1502_v52, %v2166_v63 }
 0x268   : > { %v1504_v55 = vpop.f32.mrf.mxu1 }
 0x269   : > { %v1505_v56 = vadd.f32 %v1504_v55, %v1503_v53  ;;  %1190 = vxpose.xlu0.b32.cont [14/16] (narrow) %v1102_v54, 8 }
 0x26a   : > { %v1506_v57 = vpop.f32.mrf.mxu1 }
 0x26b   : > { %v1107_v58 = vadd.f32 %v1505_v56, %v2166_v63 }
 0x26c   : > { %v1507_v59 = vpop.f32.mrf.mxu1 }
 0x26d   : > { %v1508_v60 = vadd.f32 %v1507_v59, %v1506_v57  ;;  %1191 = vxpose.xlu0.b32.cont [15/16] (narrow) %v1107_v58, 8 }
 0x26e   : > { %v1509_v61 = vpop.f32.mrf.mxu1 }
 0x26f   : > { %v1110_v62 = vadd.f32 %v1508_v60, %v2166_v63 }
 0x270   : > { %v1510_v23 = vpop.f32.mrf.mxu1 }
 0x271   : > { %v1511_v0 = vadd.f32 %v1510_v23, %v1509_v61  ;;  %1192 = vxpose.xlu0.b32.end [16/16] (narrow) %v1110_v62, 8 }
 0x272   : > { %v1512_v1 = vpop.f32.mrf.mxu1 }
 0x273   : > { %v1115_v22 = vadd.f32 %v1511_v0, %v2166_v63 }
 0x274   : > { %v1513_v2 = vpop.f32.mrf.mxu1 }
 0x275   : > { %v1514_v3 = vadd.f32 %v1513_v2, %v1512_v1  ;;  %1209 = vxpose.xlu1.b32.start [1/16] (narrow) %v1115_v22, 8 }
 0x276   : > { %v1515_v4 = vpop.f32.mrf.mxu1 }
 0x277   : > { %v1118_v5 = vadd.f32 %v1514_v3, %v2166_v63 }
 0x278   : > { %v1516_v6 = vpop.f32.mrf.mxu1 }
 0x279   : > { %v1517_v7 = vadd.f32 %v1516_v6, %v1515_v4  ;;  %1210 = vxpose.xlu1.b32.cont [2/16] (narrow) %v1118_v5, 8 }
 0x27a   : > { %v1518_v8 = vpop.f32.mrf.mxu1 }
 0x27b   : > { %v1123_v9 = vadd.f32 %v1517_v7, %v2166_v63 }
 0x27c   : > { %v1519_v10 = vpop.f32.mrf.mxu1 }
 0x27d   : > { %v1520_v11 = vadd.f32 %v1519_v10, %v1518_v8  ;;  %1211 = vxpose.xlu1.b32.cont [3/16] (narrow) %v1123_v9, 8 }
 0x27e   : > { %v1521_v12 = vpop.f32.mrf.mxu1 }
 0x27f   : > { %v1126_v13 = vadd.f32 %v1520_v11, %v2166_v63 }
 0x280   : > { %v1522_v14 = vpop.f32.mrf.mxu1 }
 0x281   : > { %v1523_v15 = vadd.f32 %v1522_v14, %v1521_v12  ;;  %1212 = vxpose.xlu1.b32.cont [4/16] (narrow) %v1126_v13, 8 }
 0x282   : > { %v1524_v16 = vpop.f32.mrf.mxu1 }
 0x283   : > { %v1131_v17 = vadd.f32 %v1523_v15, %v2166_v63 }
 0x284   : > { %v1525_v18 = vpop.f32.mrf.mxu1 }
 0x285   : > { %v1526_v19 = vadd.f32 %v1525_v18, %v1524_v16  ;;  %1213 = vxpose.xlu1.b32.cont [5/16] (narrow) %v1131_v17, 8 }
 0x286   : > { %v1527_v20 = vpop.f32.mrf.mxu1 }
 0x287   : > { %v1134_v21 = vadd.f32 %v1526_v19, %v2166_v63 }
 0x288   : > { %v1528_v24 = vpop.f32.mrf.mxu1 }
 0x289   : > { %v1529_v25 = vadd.f32 %v1528_v24, %v1527_v20  ;;  %1214 = vxpose.xlu1.b32.cont [6/16] (narrow) %v1134_v21, 8 }
 0x28a   : > { %v1530_v26 = vpop.f32.mrf.mxu1 }
 0x28b   : > { %v1139_v27 = vadd.f32 %v1529_v25, %v2166_v63 }
 0x28c   : > { %v1531_v28 = vpop.f32.mrf.mxu1 }
 0x28d   : > { %v1532_v29 = vadd.f32 %v1531_v28, %v1530_v26  ;;  %1215 = vxpose.xlu1.b32.cont [7/16] (narrow) %v1139_v27, 8 }
 0x28e   : > { %v1533_v30 = vpop.f32.mrf.mxu1 }
 0x28f   : > { %v1142_v31 = vadd.f32 %v1532_v29, %v2166_v63 }
 0x290   : > { %v1534_v32 = vpop.f32.mrf.mxu1 }
 0x291   : > { %v1535_v33 = vadd.f32 %v1534_v32, %v1533_v30  ;;  %1216 = vxpose.xlu1.b32.cont [8/16] (narrow) %v1142_v31, 8 }
 0x292   : > { %v1536_v34 = vpop.f32.mrf.mxu1 }
 0x293   : > { %v1147_v35 = vadd.f32 %v1535_v33, %v2166_v63 }
 0x294   : > { %v1537_v36 = vpop.f32.mrf.mxu1 }
 0x295   : > { %v1538_v37 = vadd.f32 %v1537_v36, %v1536_v34  ;;  %1217 = vxpose.xlu1.b32.cont [9/16] (narrow) %v1147_v35, 8 }
 0x296   : > { %v1539_v38 = vpop.f32.mrf.mxu1 }
 0x297   : > { %v1150_v39 = vadd.f32 %v1538_v37, %v2166_v63 }
 0x298   : > { %v1540_v40 = vpop.f32.mrf.mxu1 }
 0x299   : > { %v1541_v41 = vadd.f32 %v1540_v40, %v1539_v38  ;;  %1218 = vxpose.xlu1.b32.cont [10/16] (narrow) %v1150_v39, 8 }
 0x29a   : > { %v1542_v42 = vpop.f32.mrf.mxu1 }
 0x29b   : > { %v1155_v43 = vadd.f32 %v1541_v41, %v2166_v63 }
 0x29c   : > { %v1543_v44 = vpop.f32.mrf.mxu1 }
 0x29d   : > { %v1544_v45 = vadd.f32 %v1543_v44, %v1542_v42  ;;  %1219 = vxpose.xlu1.b32.cont [11/16] (narrow) %v1155_v43, 8 }
 0x29e   : > { %v1545_v46 = vpop.f32.mrf.mxu1 }
 0x29f   : > { %v1158_v47 = vadd.f32 %v1544_v45, %v2166_v63 }
 0x2a0   : > { %v1546_v48 = vpop.f32.mrf.mxu1 }
 0x2a1   : > { %v1547_v49 = vadd.f32 %v1546_v48, %v1545_v46  ;;  %1220 = vxpose.xlu1.b32.cont [12/16] (narrow) %v1158_v47, 8 }
 0x2a2   : > { %v1548_v50 = vpop.f32.mrf.mxu1 }
 0x2a3   : > { %v1163_v51 = vadd.f32 %v1547_v49, %v2166_v63 }
 0x2a4   : > { %v1549_v52 = vpop.f32.mrf.mxu1 }
 0x2a5   : > { %v1550_v53 = vadd.f32 %v1549_v52, %v1548_v50  ;;  %1221 = vxpose.xlu1.b32.cont [13/16] (narrow) %v1163_v51, 8 }
 0x2a6   : > { %v1551_v54 = vpop.f32.mrf.mxu1 }
 0x2a7   : > { %v1166_v55 = vadd.f32 %v1550_v53, %v2166_v63 }
 0x2a8   : > { %v1552_v56 = vpop.f32.mrf.mxu1 }
 0x2a9   : > { %v1553_v57 = vadd.f32 %v1552_v56, %v1551_v54  ;;  %1222 = vxpose.xlu1.b32.cont [14/16] (narrow) %v1166_v55, 8 }
 0x2aa   : > { %v1554_v58 = vpop.f32.mrf.mxu1 }
 0x2ab   : > { %v1171_v59 = vadd.f32 %v1553_v57, %v2166_v63 }
 0x2ac   : > { %v1555_v60 = vpop.f32.mrf.mxu1 }
 0x2ad   : > { %v1556_v61 = vadd.f32 %v1555_v60, %v1554_v58  ;;  %1223 = vxpose.xlu1.b32.cont [15/16] (narrow) %v1171_v59, 8 }
 0x2af   : > { %v1174_v62 = vadd.f32 %v1556_v61, %v2166_v63 }
 0x2b1   : > { %1224 = vxpose.xlu1.b32.end [16/16] (narrow) %v1174_v62, 8  ;;  %v1193_v23 = vpop.trf.xlu0 }
 0x2f0   : > { %1260 = sbr.rel (!%p2267_p10) target bundleno = 783 (0x30f), region = 56 }
 0x2f1   : > { %v1225_v0 = vpop.trf.xlu1 }
 0x2f2   : > { %v1243_v1 = vcombine.low %v1193_v23, %v1225_v0 }
 0x2f4   : > { %1431 = vst.sshfl [vmem:[%s279_s8] sm:$0x33 pattern:$0x76325410] %v1243_v1 }
 0x2f5   : > { %s2276_s23 = smov (!%p1263_p1, %s1262_s23), 2 }
 0x2f6   : > { %s2205_s25 = sshll.u32 %s2276_s23, 5 }
 0x2f7   : > { %s1267_s11 = ssub.s32 64, %s2205_s25 }
 0x2f8   : > { %1268 = vsyncadd %s1254_s17, %s1267_s11  ;;  %p1435_p3 = scmp.ne.s32.totalorder %s2205_s25, 0  ;;  %s1444_s9 = sshll.u32 %s1896_s22, 6 }
 0x2f9   : > { %s1271_s15 = scalar_lea.hbm %s2255_s5, %s1444_s9  ;;  %s1274_s12 = sshll.u32 %s279_s8, 4  ;;  %s1275_s12 = int_to_ptr.vmem [resolvable:$true] %s1274_s12 }
 0x2fa   : > { %s1765_s29 = scalar_lea.vmem %s1275_s12, %s2205_s25  ;;  %s1844_s7 = smov [#allocation8]  }
 0x2fb   : > { %p1766_p7 = scmp.ne.s32.totalorder %s1275_s12, %s1765_s29  ;;  %s1769_s10 = sshll.u32 %s1844_s7, 4  ;;  %s1770_s10 = int_to_ptr.vmem [resolvable:$false] %s1769_s10 }
 0x2fc   : > { %s1771_s16 = scalar_lea.vmem %s1770_s10, 128  ;;  %p1772_p4 = scmp.lt.s32.totalorder %s1275_s12, %s1770_s10 }
 0x2fd   : > { %p1767_p9 = pnand %p1766_p7, %p1435_p3  ;;  %p1773_p6 = scmp.lt.s32.totalorder %s1771_s16, %s1765_s29 }
 0x2ff   : > { %p1768_p12 = pneg %p1767_p9  ;;  %p1774_p11 = por %p1773_p6, %p1772_p4 }
 0x301   : > { %p1775_p0 = pnand %p1774_p11, %p1768_p12 }
 0x303   : > { %1778 = shalt.err (!%p1775_p0)
}
 0x304   : > { %s1779_s22 = scalar_lea.hbm %s1271_s15, %s2205_s25  ;;  %s1783_s28 = scalar_lea.hbm %s2255_s5, 96 }
 0x305   : > { %p1780_p2 = scmp.ne.s32.totalorder %s1271_s15, %s1779_s22  ;;  %p1784_p10 = scmp.lt.s32.totalorder %s1271_s15, %s2255_s5 }
 0x306   : > { %p1785_p1 = scmp.lt.s32.totalorder %s1783_s28, %s1779_s22 }
 0x307   : > { %p1781_p5 = pnand %p1780_p2, %p1435_p3 }
 0x308   : > { %p1786_p7 = por %p1785_p1, %p1784_p10 }
 0x309   : > { %p1782_p13 = pneg %p1781_p5 }
 0x30b   : > { %p1787_p9 = pnand %p1786_p7, %p1782_p13 }
 0x30d   : > { %1790 = shalt.err (!%p1787_p9)
}
 0x30e   : > { %1277 = dma.vmem_to_hbm [thread:$0]  (%p1435_p3), %s1275_s12, %s2205_s25, %s1271_s15, %s1254_s17  }
 0x30f PF: > { %s1286_s9 = sand.u32 1, %s1821_s18   ;;  %p2268_p12 = scmp.ne.s32.totalorder %s2261_s6, 0 }
 0x310   : > { %s1287_s30 = scalar_lea.sflag [#allocation4], %s1286_s9 }
 0x311   : > { %p1575_p4 = pnand %p1367_p8, %p2268_p12 }
 0x313   : > { %p1576_p6 = pneg %p1575_p4 }
 0x315   : > { %1816 = dma.done.wait (%p1576_p6), %s1287_s30, 64  }
 0x316   : > { %1818 = vsyncadd (%p1576_p6), %s1287_s30, 4294967232  ;;  %p19_p11 = scmp.ge.s32.totalorder %s1900_s24, 4   ;;  %s2269_s18 = smov %s1825_s19 }
 0x317   : > { %s2270_s19 = smov %s1829_s20  ;;  %s2271_s20 = smov %s1912_s27 }
 0x318   : > { %s2272_s21 = smov %s1900_s24  ;;  %21 = sbr.rel (!%p19_p11) target bundleno = 6 (0x6), region = 93 }
 0x31d   :  { %1292 = vsyncpa [#allocation3], 1 }
 0x31e   :  { %1294 = vsyncpa [#allocation3 + $0x1], 1 }
 0x31f   :  { %1295 = vsyncpa [#allocation6], 1 }
 0x320   :  { %1296 = vsyncpa [#allocation4], 1 }
 0x321   :  { %1298 = vsyncpa [#allocation4 + $0x1], 1 }

</bundles_post_ra>
